<compile_context>
chip_gen: v6e
topology: v6e:2x2x1
jax: 0.10.0
libtpu: 0.0.40
codegen_flags: <defaults>
</compile_context>

<pallas_src>
import jax
import jax.numpy as jnp
from jax.experimental import pallas as pl
from jax.experimental.pallas import tpu as pltpu

LN_EPS = 1e-5  # torch.nn.LayerNorm default

_MAX_TILE_B = 2048   # ~1 MiB per padded f32 x-tile; amortizes ~0.35us/step overhead
_MIN_STEPS = 4       # >= 2 steps per TensorCore on v7x (2 TCs) -> pipeline + megacore


def _round_up(n, m):
    return ((n + m - 1) // m) * m


def _choose_tile_b(B):
    """Batch tile: multiple of 8 sublanes, >= _MIN_STEPS grid steps when possible."""
    if B <= 8 * _MIN_STEPS:
        return B  # too small to split usefully; single resident tile
    return min(_MAX_TILE_B, _round_up(pl.cdiv(B, _MIN_STEPS), 8))


def _layernorm_fused(h, gamma, beta):
    """One-pass LN stats: both lane reductions are independent (shorter XLU chain).

    Note: E[x^2]-E[x]^2 is less stable than the two-pass form; the clamp keeps it
    NaN-free and f32 is plenty for these widths (tolerance-tested vs the reference).
    """
    n = h.shape[-1]
    s1 = jnp.sum(h, axis=-1, keepdims=True)
    s2 = jnp.sum(h * h, axis=-1, keepdims=True)
    mu = s1 * (1.0 / n)
    var = jnp.maximum(s2 * (1.0 / n) - mu * mu, 0.0)
    return (h - mu) * jax.lax.rsqrt(var + LN_EPS) * gamma + beta


def critic_kernel(xa_ref,
                  w1_ref, b1_ref, g1_ref, be1_ref,
                  w2x_ref, w2a_ref, b2_ref, g2_ref, be2_ref,
                  wv_ref, bv_ref,
                  out_ref):
    in_dim = w1_ref.shape[0]          # static: x columns of the fused [x | a] block
    xa = xa_ref[...]
    x = xa[:, :in_dim]
    a = xa[:, in_dim:]                # (tile_b, 1) action column

    # fc1 -> ln1 -> relu                                  (MXU matmul #1)
    h1 = jnp.dot(x, w1_ref[...], preferred_element_type=jnp.float32) + b1_ref[...]
    h1 = jnp.maximum(_layernorm_fused(h1, g1_ref[...], be1_ref[...]), 0.0)

    # fc2(cat[h1, a]) == h1 @ W2x + a * w2a_row + b2      (MXU matmul #2 + VPU K=1 path)
    h2 = (jnp.dot(h1, w2x_ref[...], preferred_element_type=jnp.float32)
          + a * w2a_ref[...]
          + b2_ref[...])
    h2 = jnp.maximum(_layernorm_fused(h2, g2_ref[...], be2_ref[...]), 0.0)

    # Value head on the MXU (wv stored (fc2, out)).  Keeps the 2 XLUs on
    # v6e/v7x free for the four LayerNorm lane reductions instead of adding
    # a fifth cross-lane reduce; the MXU is otherwise idle here.
    out_ref[...] = (jnp.dot(h2, wv_ref[...], preferred_element_type=jnp.float32)
                    + bv_ref[...])


def critic_forward(x, actions, params, *, tile_b=None):
    """x: (B, input_size) f32, actions: (B, 1) f32 -> (B, output_size) f32."""
    B, in_dim = x.shape
    act_dim = actions.shape[1]
    assert act_dim == 1, "DDPG Critic concat is hardcoded to a single action dim"
    out_dim = params["wv"].shape[1]

    # Fold actions into the x stream: one batch DMA per grid step instead of two
    # (the extra (tile_b, 1) actions tile was 127/128 lane padding).
    xa = jnp.concatenate([x, actions.astype(x.dtype)], axis=1)

    tile_b = _choose_tile_b(B) if tile_b is None else tile_b
    grid = (pl.cdiv(B, tile_b),)

    batch_map = lambda i: (i, 0)   # batch-tiled arrays
    const_map = lambda i: (0, 0)   # VMEM-resident params (block index never changes)
    full = lambda arr: pl.BlockSpec(arr.shape, const_map)

    in_specs = [
        pl.BlockSpec((tile_b, in_dim + act_dim), batch_map),
        full(params["w1"]), full(params["b1"]), full(params["g1"]), full(params["be1"]),
        full(params["w2x"]), full(params["w2a"]), full(params["b2"]),
        full(params["g2"]), full(params["be2"]),
        full(params["wv"]), full(params["bv"]),
    ]
    out_specs = pl.BlockSpec((tile_b, out_dim), batch_map)

    return pl.pallas_call(
        critic_kernel,
        out_shape=jax.ShapeDtypeStruct((B, out_dim), jnp.float32),
        grid=grid,
        in_specs=in_specs,
        out_specs=out_specs,
        compiler_params=pltpu.CompilerParams(
            dimension_semantics=("parallel",),          # megacore-shard the batch axis
            vmem_limit_bytes=32 * 1024 * 1024,          # headroom for v5e's 16 MiB default
        ),
    )(xa,
      params["w1"], params["b1"], params["g1"], params["be1"],
      params["w2x"], params["w2a"], params["b2"], params["g2"], params["be2"],
      params["wv"], params["bv"])


def init_params(key, input_size, output_size, configs):
    """Deterministic init mirroring the PyTorch module's __init__ shapes/rules."""
    fc1_dim, fc2_dim = configs["fc"]
    act = configs["action_space"]
    ks = jax.random.split(key, 6)

    def u(k, shape, bound):
        return jax.random.uniform(k, shape, jnp.float32, -bound, bound)

    k1 = 1.0 / jnp.sqrt(input_size)          # nn.Linear default init bound
    k2 = 1.0 / jnp.sqrt(fc1_dim + act)

    w2_full = u(ks[2], (fc1_dim + act, fc2_dim), k2)   # (in, out) layout
    params = {
        "w1": u(ks[0], (input_size, fc1_dim), k1),
        "b1": u(ks[1], (1, fc1_dim), k1),
        "g1": jnp.ones((1, fc1_dim), jnp.float32),
        "be1": jnp.zeros((1, fc1_dim), jnp.float32),
        # fc2 split into the h1 part (matmul) and the action row (broadcast mul)
        "w2x": w2_full[:fc1_dim, :],
        "w2a": w2_full[fc1_dim:, :],                   # (1, fc2_dim)
        "b2": u(ks[3], (1, fc2_dim), k2),
        "g2": jnp.ones((1, fc2_dim), jnp.float32),
        "be2": jnp.zeros((1, fc2_dim), jnp.float32),
        # Value head stored (fc2, out) for the tiny MXU matmul path
        "wv": u(ks[4], (fc2_dim, output_size), 0.003),   # WEIGHTS_FINAL_INIT
        "bv": u(ks[5], (1, output_size), 0.0003),        # BIAS_FINAL_INIT
    }
    return params


def critic_reference(x, actions, params):
    """Independent pure-JAX reference (standard two-pass LN, explicit concat)."""
    def ln(h, g, b):
        mu = jnp.mean(h, axis=-1, keepdims=True)
        var = jnp.mean((h - mu) ** 2, axis=-1, keepdims=True)
        return (h - mu) / jnp.sqrt(var + LN_EPS) * g + b

    h1 = jnp.maximum(ln(x @ params["w1"] + params["b1"],
                        params["g1"], params["be1"]), 0.0)
    w2_full = jnp.concatenate([params["w2x"], params["w2a"]], axis=0)
    xa = jnp.concatenate([h1, actions], axis=1)
    h2 = jnp.maximum(ln(xa @ w2_full + params["b2"],
                        params["g2"], params["be2"]), 0.0)
    return h2 @ params["wv"] + params["bv"]


if __name__ == "__main__":
    configs = {"action_space": 1, "fc": [20, 30]}
    input_size = 8
    output_size = 1

    key = jax.random.PRNGKey(0)
    kx, ka, kp, kx2, ka2 = jax.random.split(key, 5)
    params = init_params(kp, input_size, output_size, configs)

    # Primary check: batch=64 -> tile_b=16 -> grid=(4,), exercising the
    # multi-step pipelined / megacore-sharded path.
    B = 64
    x = jax.random.normal(kx, (B, input_size), jnp.float32)
    actions = jax.random.normal(ka, (B, configs["action_space"]), jnp.float32)
    v = critic_forward(x, actions, params)
    jax.block_until_ready(v)
    v_ref = critic_reference(x, actions, params)
    assert v.shape == (B, output_size)
    assert jnp.allclose(v, v_ref, atol=1e-5, rtol=1e-5)

    # Ragged check: batch not a multiple of the tile (partial trailing block).
    B2 = 50
    x2 = jax.random.normal(kx2, (B2, input_size), jnp.float32)
    actions2 = jax.random.normal(ka2, (B2, configs["action_space"]), jnp.float32)
    v2 = critic_forward(x2, actions2, params)
    jax.block_until_ready(v2)
    assert v2.shape == (B2, output_size)
    assert jnp.allclose(v2, critic_reference(x2, actions2, params),
                        atol=1e-5, rtol=1e-5)

    print("KERNEL_OK")
</pallas_src>

<mosaic_0001>
module attributes {stable_mosaic.version = 11 : i64} {
  func.func @critic_kernel(%arg0: i32, %arg1: memref<16x9xf32, #tpu.memory_space<vmem>>, %arg2: memref<8x20xf32, #tpu.memory_space<vmem>>, %arg3: memref<1x20xf32, #tpu.memory_space<vmem>>, %arg4: memref<1x20xf32, #tpu.memory_space<vmem>>, %arg5: memref<1x20xf32, #tpu.memory_space<vmem>>, %arg6: memref<20x30xf32, #tpu.memory_space<vmem>>, %arg7: memref<1x30xf32, #tpu.memory_space<vmem>>, %arg8: memref<1x30xf32, #tpu.memory_space<vmem>>, %arg9: memref<1x30xf32, #tpu.memory_space<vmem>>, %arg10: memref<1x30xf32, #tpu.memory_space<vmem>>, %arg11: memref<30x1xf32, #tpu.memory_space<vmem>>, %arg12: memref<1x1xf32, #tpu.memory_space<vmem>>, %arg13: memref<16x1xf32, #tpu.memory_space<vmem>>) attributes {dimension_semantics = [#tpu.dimension_semantics<parallel>], iteration_bounds = array<i64: 4>, scalar_prefetch = 0 : i64, scratch_operands = 0 : i64, tpu.core_type = #tpu.core_type<tc>, window_params = [{transform_indices = @transform_0, window_bounds = array<i64: 16, 9>}, {pipeline_mode = #tpu.pipeline_mode<synchronous>, transform_indices = @transform_1, window_bounds = array<i64: 8, 20>}, {pipeline_mode = #tpu.pipeline_mode<synchronous>, transform_indices = @transform_2, window_bounds = array<i64: 1, 20>}, {pipeline_mode = #tpu.pipeline_mode<synchronous>, transform_indices = @transform_3, window_bounds = array<i64: 1, 20>}, {pipeline_mode = #tpu.pipeline_mode<synchronous>, transform_indices = @transform_4, window_bounds = array<i64: 1, 20>}, {pipeline_mode = #tpu.pipeline_mode<synchronous>, transform_indices = @transform_5, window_bounds = array<i64: 20, 30>}, {pipeline_mode = #tpu.pipeline_mode<synchronous>, transform_indices = @transform_6, window_bounds = array<i64: 1, 30>}, {pipeline_mode = #tpu.pipeline_mode<synchronous>, transform_indices = @transform_7, window_bounds = array<i64: 1, 30>}, {pipeline_mode = #tpu.pipeline_mode<synchronous>, transform_indices = @transform_8, window_bounds = array<i64: 1, 30>}, {pipeline_mode = #tpu.pipeline_mode<synchronous>, transform_indices = @transform_9, window_bounds = array<i64: 1, 30>}, {pipeline_mode = #tpu.pipeline_mode<synchronous>, transform_indices = @transform_10, window_bounds = array<i64: 30, 1>}, {pipeline_mode = #tpu.pipeline_mode<synchronous>, transform_indices = @transform_11, window_bounds = array<i64: 1, 1>}, {transform_indices = @transform_12, window_bounds = array<i64: 16, 1>}]} {
    %c0 = arith.constant 0 : index
    %c0_0 = arith.constant 0 : index
    %0 = vector.load %arg1[%c0, %c0_0] : memref<16x9xf32, #tpu.memory_space<vmem>>, vector<16x9xf32>
    %1 = vector.extract_strided_slice %0 {offsets = [0, 0], sizes = [16, 8], strides = [1, 1]} : vector<16x9xf32> to vector<16x8xf32>
    %2 = vector.extract_strided_slice %0 {offsets = [0, 8], sizes = [16, 1], strides = [1, 1]} : vector<16x9xf32> to vector<16x1xf32>
    %c0_1 = arith.constant 0 : index
    %c0_2 = arith.constant 0 : index
    %3 = vector.load %arg2[%c0_1, %c0_2] : memref<8x20xf32, #tpu.memory_space<vmem>>, vector<8x20xf32>
    %cst = arith.constant dense<0.000000e+00> : vector<16x20xf32>
    %4 = tpu.matmul %1, %3, %cst {dimension_numbers = #tpu.dot_dimension_numbers<[1], [0], [0], [1], [0, 0, 1, 1], [], []>} : vector<16x8xf32>, vector<8x20xf32>, vector<16x20xf32> -> vector<16x20xf32>
    %c0_3 = arith.constant 0 : index
    %c0_4 = arith.constant 0 : index
    %5 = vector.load %arg3[%c0_3, %c0_4] : memref<1x20xf32, #tpu.memory_space<vmem>>, vector<1x20xf32>
    %6 = vector.broadcast %5 : vector<1x20xf32> to vector<16x20xf32>
    %7 = arith.addf %4, %6 : vector<16x20xf32>
    %c0_5 = arith.constant 0 : index
    %c0_6 = arith.constant 0 : index
    %8 = vector.load %arg4[%c0_5, %c0_6] : memref<1x20xf32, #tpu.memory_space<vmem>>, vector<1x20xf32>
    %c0_7 = arith.constant 0 : index
    %c0_8 = arith.constant 0 : index
    %9 = vector.load %arg5[%c0_7, %c0_8] : memref<1x20xf32, #tpu.memory_space<vmem>>, vector<1x20xf32>
    %cst_9 = arith.constant dense<0.000000e+00> : vector<16xf32>
    %10 = vector.multi_reduction <add>, %7, %cst_9 [1] : vector<16x20xf32> to vector<16xf32>
    %11 = vector.shape_cast %10 : vector<16xf32> to vector<16x1xf32>
    %12 = arith.mulf %7, %7 : vector<16x20xf32>
    %cst_10 = arith.constant dense<0.000000e+00> : vector<16xf32>
    %13 = vector.multi_reduction <add>, %12, %cst_10 [1] : vector<16x20xf32> to vector<16xf32>
    %14 = vector.shape_cast %13 : vector<16xf32> to vector<16x1xf32>
    %cst_11 = arith.constant 5.000000e-02 : f32
    %15 = vector.broadcast %cst_11 : f32 to vector<16x1xf32>
    %16 = arith.mulf %11, %15 : vector<16x1xf32>
    %cst_12 = arith.constant 5.000000e-02 : f32
    %17 = vector.broadcast %cst_12 : f32 to vector<16x1xf32>
    %18 = arith.mulf %14, %17 : vector<16x1xf32>
    %19 = arith.mulf %16, %16 : vector<16x1xf32>
    %20 = arith.subf %18, %19 : vector<16x1xf32>
    %cst_13 = arith.constant 0.000000e+00 : f32
    %21 = vector.broadcast %cst_13 : f32 to vector<16x1xf32>
    %22 = arith.maximumf %20, %21 : vector<16x1xf32>
    %23 = vector.broadcast %16 : vector<16x1xf32> to vector<16x20xf32>
    %24 = arith.subf %7, %23 : vector<16x20xf32>
    %cst_14 = arith.constant 9.99999974E-6 : f32
    %25 = vector.broadcast %cst_14 : f32 to vector<16x1xf32>
    %26 = arith.addf %22, %25 : vector<16x1xf32>
    %27 = math.rsqrt %26 : vector<16x1xf32>
    %28 = vector.broadcast %27 : vector<16x1xf32> to vector<16x20xf32>
    %29 = arith.mulf %24, %28 : vector<16x20xf32>
    %30 = vector.broadcast %8 : vector<1x20xf32> to vector<16x20xf32>
    %31 = arith.mulf %29, %30 : vector<16x20xf32>
    %32 = vector.broadcast %9 : vector<1x20xf32> to vector<16x20xf32>
    %33 = arith.addf %31, %32 : vector<16x20xf32>
    %cst_15 = arith.constant 0.000000e+00 : f32
    %34 = vector.broadcast %cst_15 : f32 to vector<16x20xf32>
    %35 = arith.maximumf %33, %34 : vector<16x20xf32>
    %c0_16 = arith.constant 0 : index
    %c0_17 = arith.constant 0 : index
    %36 = vector.load %arg6[%c0_16, %c0_17] : memref<20x30xf32, #tpu.memory_space<vmem>>, vector<20x30xf32>
    %cst_18 = arith.constant dense<0.000000e+00> : vector<16x30xf32>
    %37 = tpu.matmul %35, %36, %cst_18 {dimension_numbers = #tpu.dot_dimension_numbers<[1], [0], [0], [1], [0, 0, 1, 1], [], []>} : vector<16x20xf32>, vector<20x30xf32>, vector<16x30xf32> -> vector<16x30xf32>
    %c0_19 = arith.constant 0 : index
    %c0_20 = arith.constant 0 : index
    %38 = vector.load %arg7[%c0_19, %c0_20] : memref<1x30xf32, #tpu.memory_space<vmem>>, vector<1x30xf32>
    %39 = vector.broadcast %2 : vector<16x1xf32> to vector<16x30xf32>
    %40 = vector.broadcast %38 : vector<1x30xf32> to vector<16x30xf32>
    %41 = arith.mulf %39, %40 : vector<16x30xf32>
    %42 = arith.addf %37, %41 : vector<16x30xf32>
    %c0_21 = arith.constant 0 : index
    %c0_22 = arith.constant 0 : index
    %43 = vector.load %arg8[%c0_21, %c0_22] : memref<1x30xf32, #tpu.memory_space<vmem>>, vector<1x30xf32>
    %44 = vector.broadcast %43 : vector<1x30xf32> to vector<16x30xf32>
    %45 = arith.addf %42, %44 : vector<16x30xf32>
    %c0_23 = arith.constant 0 : index
    %c0_24 = arith.constant 0 : index
    %46 = vector.load %arg9[%c0_23, %c0_24] : memref<1x30xf32, #tpu.memory_space<vmem>>, vector<1x30xf32>
    %c0_25 = arith.constant 0 : index
    %c0_26 = arith.constant 0 : index
    %47 = vector.load %arg10[%c0_25, %c0_26] : memref<1x30xf32, #tpu.memory_space<vmem>>, vector<1x30xf32>
    %cst_27 = arith.constant dense<0.000000e+00> : vector<16xf32>
    %48 = vector.multi_reduction <add>, %45, %cst_27 [1] : vector<16x30xf32> to vector<16xf32>
    %49 = vector.shape_cast %48 : vector<16xf32> to vector<16x1xf32>
    %50 = arith.mulf %45, %45 : vector<16x30xf32>
    %cst_28 = arith.constant dense<0.000000e+00> : vector<16xf32>
    %51 = vector.multi_reduction <add>, %50, %cst_28 [1] : vector<16x30xf32> to vector<16xf32>
    %52 = vector.shape_cast %51 : vector<16xf32> to vector<16x1xf32>
    %cst_29 = arith.constant 0.0333333351 : f32
    %53 = vector.broadcast %cst_29 : f32 to vector<16x1xf32>
    %54 = arith.mulf %49, %53 : vector<16x1xf32>
    %cst_30 = arith.constant 0.0333333351 : f32
    %55 = vector.broadcast %cst_30 : f32 to vector<16x1xf32>
    %56 = arith.mulf %52, %55 : vector<16x1xf32>
    %57 = arith.mulf %54, %54 : vector<16x1xf32>
    %58 = arith.subf %56, %57 : vector<16x1xf32>
    %cst_31 = arith.constant 0.000000e+00 : f32
    %59 = vector.broadcast %cst_31 : f32 to vector<16x1xf32>
    %60 = arith.maximumf %58, %59 : vector<16x1xf32>
    %61 = vector.broadcast %54 : vector<16x1xf32> to vector<16x30xf32>
    %62 = arith.subf %45, %61 : vector<16x30xf32>
    %cst_32 = arith.constant 9.99999974E-6 : f32
    %63 = vector.broadcast %cst_32 : f32 to vector<16x1xf32>
    %64 = arith.addf %60, %63 : vector<16x1xf32>
    %65 = math.rsqrt %64 : vector<16x1xf32>
    %66 = vector.broadcast %65 : vector<16x1xf32> to vector<16x30xf32>
    %67 = arith.mulf %62, %66 : vector<16x30xf32>
    %68 = vector.broadcast %46 : vector<1x30xf32> to vector<16x30xf32>
    %69 = arith.mulf %67, %68 : vector<16x30xf32>
    %70 = vector.broadcast %47 : vector<1x30xf32> to vector<16x30xf32>
    %71 = arith.addf %69, %70 : vector<16x30xf32>
    %cst_33 = arith.constant 0.000000e+00 : f32
    %72 = vector.broadcast %cst_33 : f32 to vector<16x30xf32>
    %73 = arith.maximumf %71, %72 : vector<16x30xf32>
    %c0_34 = arith.constant 0 : index
    %c0_35 = arith.constant 0 : index
    %74 = vector.load %arg11[%c0_34, %c0_35] : memref<30x1xf32, #tpu.memory_space<vmem>>, vector<30x1xf32>
    %cst_36 = arith.constant dense<0.000000e+00> : vector<16x1xf32>
    %75 = tpu.matmul %73, %74, %cst_36 {dimension_numbers = #tpu.dot_dimension_numbers<[1], [0], [0], [1], [0, 0, 1, 1], [], []>} : vector<16x30xf32>, vector<30x1xf32>, vector<16x1xf32> -> vector<16x1xf32>
    %c0_37 = arith.constant 0 : index
    %c0_38 = arith.constant 0 : index
    %76 = vector.load %arg12[%c0_37, %c0_38] : memref<1x1xf32, #tpu.memory_space<vmem>>, vector<1x1xf32>
    %77 = vector.broadcast %76 : vector<1x1xf32> to vector<16x1xf32>
    %78 = arith.addf %75, %77 : vector<16x1xf32>
    %c0_39 = arith.constant 0 : index
    %c0_40 = arith.constant 0 : index
    %79 = vector.load %arg13[%c0_39, %c0_40] : memref<16x1xf32, #tpu.memory_space<vmem>>, vector<16x1xf32>
    tpu.vector_store %arg13[%c0_39, %c0_40], %78 {strides = array<i32>} : memref<16x1xf32, #tpu.memory_space<vmem>>, vector<16x1xf32>,
    return
  }
  func.func @transform_0(%arg0: i32) -> (i32, i32) {
    %c0_i32 = arith.constant 0 : i32
    %c0_i32_0 = arith.constant 0 : i32
    return %arg0, %c0_i32 : i32, i32
  }
  func.func @transform_1(%arg0: i32) -> (i32, i32) {
    %c0_i32 = arith.constant 0 : i32
    %c0_i32_0 = arith.constant 0 : i32
    %c0_i32_1 = arith.constant 0 : i32
    return %c0_i32, %c0_i32_0 : i32, i32
  }
  func.func @transform_2(%arg0: i32) -> (i32, i32) {
    %c0_i32 = arith.constant 0 : i32
    %c0_i32_0 = arith.constant 0 : i32
    %c0_i32_1 = arith.constant 0 : i32
    return %c0_i32, %c0_i32_0 : i32, i32
  }
  func.func @transform_3(%arg0: i32) -> (i32, i32) {
    %c0_i32 = arith.constant 0 : i32
    %c0_i32_0 = arith.constant 0 : i32
    %c0_i32_1 = arith.constant 0 : i32
    return %c0_i32, %c0_i32_0 : i32, i32
  }
  func.func @transform_4(%arg0: i32) -> (i32, i32) {
    %c0_i32 = arith.constant 0 : i32
    %c0_i32_0 = arith.constant 0 : i32
    %c0_i32_1 = arith.constant 0 : i32
    return %c0_i32, %c0_i32_0 : i32, i32
  }
  func.func @transform_5(%arg0: i32) -> (i32, i32) {
    %c0_i32 = arith.constant 0 : i32
    %c0_i32_0 = arith.constant 0 : i32
    %c0_i32_1 = arith.constant 0 : i32
    return %c0_i32, %c0_i32_0 : i32, i32
  }
  func.func @transform_6(%arg0: i32) -> (i32, i32) {
    %c0_i32 = arith.constant 0 : i32
    %c0_i32_0 = arith.constant 0 : i32
    %c0_i32_1 = arith.constant 0 : i32
    return %c0_i32, %c0_i32_0 : i32, i32
  }
  func.func @transform_7(%arg0: i32) -> (i32, i32) {
    %c0_i32 = arith.constant 0 : i32
    %c0_i32_0 = arith.constant 0 : i32
    %c0_i32_1 = arith.constant 0 : i32
    return %c0_i32, %c0_i32_0 : i32, i32
  }
  func.func @transform_8(%arg0: i32) -> (i32, i32) {
    %c0_i32 = arith.constant 0 : i32
    %c0_i32_0 = arith.constant 0 : i32
    %c0_i32_1 = arith.constant 0 : i32
    return %c0_i32, %c0_i32_0 : i32, i32
  }
  func.func @transform_9(%arg0: i32) -> (i32, i32) {
    %c0_i32 = arith.constant 0 : i32
    %c0_i32_0 = arith.constant 0 : i32
    %c0_i32_1 = arith.constant 0 : i32
    return %c0_i32, %c0_i32_0 : i32, i32
  }
  func.func @transform_10(%arg0: i32) -> (i32, i32) {
    %c0_i32 = arith.constant 0 : i32
    %c0_i32_0 = arith.constant 0 : i32
    %c0_i32_1 = arith.constant 0 : i32
    return %c0_i32, %c0_i32_0 : i32, i32
  }
  func.func @transform_11(%arg0: i32) -> (i32, i32) {
    %c0_i32 = arith.constant 0 : i32
    %c0_i32_0 = arith.constant 0 : i32
    %c0_i32_1 = arith.constant 0 : i32
    return %c0_i32, %c0_i32_0 : i32, i32
  }
  func.func @transform_12(%arg0: i32) -> (i32, i32) {
    %c0_i32 = arith.constant 0 : i32
    %c0_i32_0 = arith.constant 0 : i32
    return %arg0, %c0_i32 : i32, i32
  }
}

</mosaic_0001>

<bundles_post_ra>
// kernel: tpu_custom_call.1
= control target key start
LH: loop header
LB: loop body
LE: loop exit
PB: predicated region body
PF: predicated region fallthrough
CT: control target
= control target key end

     0   :  { %s1048_s23 = smov 0   ;;  %s1129_s0 = inlined_call_operand.vmem [shape: f32[64,9], index: 0, kind: input, shape index: {}]   ;;  %s1130_s1 = inlined_call_operand.vmem [shape: f32[8,20], index: 1, kind: input, shape index: {}]   ;;  %s1131_s2 = inlined_call_operand.vmem [shape: f32[1,20], index: 2, kind: input, shape index: {}]   ;;  %s1132_s3 = inlined_call_operand.vmem [shape: f32[1,20], index: 3, kind: input, shape index: {}]   ;;  %s1133_s4 = inlined_call_operand.vmem [shape: f32[1,20], index: 4, kind: input, shape index: {}]   ;;  %s1134_s5 = inlined_call_operand.vmem [shape: f32[20,30], index: 5, kind: input, shape index: {}]   ;;  %s1135_s6 = inlined_call_operand.vmem [shape: f32[1,30], index: 6, kind: input, shape index: {}]   ;;  %s1136_s7 = inlined_call_operand.vmem [shape: f32[1,30], index: 7, kind: input, shape index: {}]   ;;  %s1137_s8 = inlined_call_operand.vmem [shape: f32[1,30], index: 8, kind: input, shape index: {}]   ;;  %s1138_s9 = inlined_call_operand.vmem [shape: f32[1,30], index: 9, kind: input, shape index: {}]   ;;  %s1139_s10 = inlined_call_operand.vmem [shape: f32[30,1], index: 10, kind: input, shape index: {}]   ;;  %s1140_s11 = inlined_call_operand.<no memory space> [shape: f32[1,1], index: 11, kind: input, shape index: {}]   ;;  %s1141_s12 = inlined_call_operand.vmem [shape: f32[64,1], index: 12, kind: output, shape index: {}]  }
   0x1   :  { %v17_v0 = vstv %s1140_s11 }
   0x2   :  { %18 = vst [vmem:[#allocation2] sm:$0x1] %v17_v0 }
   0x3 LB: > { %s886_s24 = sadd.s32 4294967295, %s977_s23   ;;  %p890_p0 = scmp.ge.s32.totalorder %s977_s23, 1  ;;  %s977_s23 = sphi %s1048_s23, %s24_s23  }
   0x4   : > { %p365_p1 = scmp.lt.s32.totalorder %s977_s23, 5 }
   0x6   : > { %p366_p2 = pnand %p890_p0, %p365_p1 }
   0x7   : > { %s891_s11 = sshll.u32 (!%p366_p2), %s886_s24, 1 }
   0x8   : > { %369 = sbr.rel (%p366_p2) target bundleno = 964 (0x3c4), region = 68  ;;  %p408_p3 = scmp.lt.s32.totalorder (!%p366_p2), %s891_s11, 7 }
   0xd   : > { %v421_v1 = vld [vmem:[%s1130_s1] sm:$0xff]  ;;  %s1143_s11 = smov (!%p408_p3, %s891_s11), 7  ;;  %vm429_vm0 = vcmask 64512   ;;  %vm513_vm1 = vcmask 162816   ;;  %v566_v15 = vld [vmem:[%s1134_s5 + $0x10] sm:$0xf] }
   0xe   : > { %927 = vmatprep.subr.mxu1 %v421_v1  ;;  %s892_s27 = sshll.u32 %s1143_s11, 3  ;;  %v895_v5 = vld [vmem:[%s1131_s2] ss:$0 sm:$0xff]  ;;  %vm590_vm2 = vcmask 1043456   ;;  %v565_v16 = vld [vmem:[%s1134_s5 + $0x8] sm:$0xff]  ;;  %v979_v18 = vmov 8  }
   0xf   : > { %928 = vmatpush3.msra.mxu1 %v421_v1  ;;  %s411_s30 = scalar_lea.vmem %s1129_s0, %s892_s27  ;;  %v564_v17 = vld [vmem:[%s1134_s5] sm:$0xff]  ;;  %962 = vset.pattern.permute.xlu1 %v979_v18  ;;  %vm680_vm3 = vcmask 244736   ;;  %vm748_vm4 = vcmask 1045504   ;;  %s417_s29 = scalar_lea.vmem %s1141_s12, %s892_s27  ;;  %vm827_vm5 = vcmask 7168  }
  0x10   : > { %v419_v2 = vld [vmem:[%s411_s30] sm:$0xff]  ;;  %v420_v3 = vld [vmem:[%s411_s30 + $0x8] sm:$0xff]  ;;  %932 = vmatprep.subr.msk.mxu1 %vm590_vm2, %v566_v15  ;;  %961 = vset.pattern.permute.xlu0 %v979_v18 }
  0x11   : > { %929 = vmatprep.mubr.msk.f32.mxu1 %vm429_vm0, %v419_v2  ;;  %v898_v37 = vld [vmem:[%s1132_s3] ss:$0 sm:$0xff] }
  0x12   : > { %930 = vmatmul.mubr.msk.f32.vlgmr.msra.gmra.mxu1 %vm429_vm0, %v420_v3  ;;  %v899_v39 = vld [vmem:[%s1133_s4] ss:$0 sm:$0xff] }
  0x13   : > { %933 = vmatpush3.msk.msra.mxu1 %vm590_vm2, %v566_v15  ;;  %v900_v49 = vld [vmem:[%s1135_s6] ss:$0 sm:$0xff] }
  0x14   : > { %934 = vmatprep.subr.mxu1 %v565_v16  ;;  %v904_v55 = vld [vmem:[%s1136_s7] ss:$0 sm:$0xff] }
  0x15   : > { %935 = vmatpush3.msra.mxu1 %v565_v16 }
  0x16   : > { %936 = vmatprep.subr.mxu1 %v564_v17 }
  0x17   : > { %937 = vmatpush3.msra.mxu1 %v564_v17 }
  0xd2   : > { %v931_v4 = vpop.f32.mrf.mxu1 }
  0xd3   : > { %v508_v7 = vadd.f32 %v931_v4, %v895_v5  ;;  %v733_v4 = vld [vmem:[%s1139_s10 + $0x10] sm:$0xff] }
  0xd4   : > { %v502_v6 = vpop.f32.mrf.mxu1 }
  0xd5   : > { %v503_v8 = vadd.f32 %v895_v5, %v502_v6  ;;  %v521_v12 = vmul.f32 %v508_v7, %v508_v7  ;;  %v517_v13 = vsel %vm513_vm1, %v508_v7, 0.0  ;;  %v732_v5 = vld [vmem:[%s1139_s10 + $0x8] sm:$0xff]  ;;  %v731_v6 = vld [vmem:[%s1139_s10] sm:$0xff] }
  0xd7   : > { %v514_v9 = vsel %vm513_vm1, %v503_v8, 0.0  ;;  %v520_v10 = vmul.f32 %v503_v8, %v503_v8  ;;  %v525_v14 = vsel %vm513_vm1, %v521_v12, 0.0 }
  0xd8   : > { %515 = vadd.xlane.f32.xlu0 %v514_v9 }
  0xd9   : > { %v522_v11 = vsel %vm513_vm1, %v520_v10, 0.0 }
  0xda   : > { %523 = vadd.xlane.f32.xlu1 %v522_v11 }
  0xdc   : > { %518 = vadd.xlane.f32.xlu0 %v517_v13 }
  0xde   : > { %526 = vadd.xlane.f32.xlu1 %v525_v14 }
  0xef   : > { %573 = vperm.xlu1 %962, %v420_v3   ;;  %v734_v3 = vld [vmem:[%s1139_s10 + $0x18] sm:$0x3f] }
  0xf0   : > { %941 = vmatprep.subr.msk.mxu0 %vm748_vm4, %v734_v3 }
  0xf1   : > { %942 = vmatpush3.msk.msra.mxu0 %vm748_vm4, %v734_v3 }
  0xf2   : > { %569 = vperm.xlu0 %961, %v419_v2   ;;  %943 = vmatprep.subr.mxu0 %v733_v4 }
  0xf3   : > { %944 = vmatpush3.msra.mxu0 %v733_v4 }
  0xf4   : > { %945 = vmatprep.subr.mxu0 %v732_v5 }
  0xf5   : > { %946 = vmatpush3.msra.mxu0 %v732_v5 }
  0xf6   : > { %947 = vmatprep.subr.mxu0 %v731_v6 }
  0xf7   : > { %948 = vmatpush3.msra.mxu0 %v731_v6 }
 0x161   : > { %v516_v19 = vpop.xlane.xlu0 %515 }
 0x162   : > { %v528_v20 = vmul.f32 0.05, %v516_v19 }
 0x163   : > { %v524_v21 = vpop.xlane.xlu1 %523 }
 0x164   : > { %v532_v22 = vmul.f32 %v528_v20, %v528_v20  ;;  %v530_v23 = vmul.f32 0.05, %v524_v21  ;;  %v538_v35 = vsub.f32 %v503_v8, %v528_v20 }
 0x165   : > { %v519_v24 = vpop.xlane.xlu0 %518 }
 0x166   : > { %v534_v25 = vsub.f32 %v530_v23, %v532_v22  ;;  %v529_v26 = vmul.f32 0.05, %v519_v24 }
 0x167   : > { %v527_v27 = vpop.xlane.xlu1 %526 }
 0x168   : > { %v536_v28 = vmax.f32 %v534_v25, 0.0  ;;  %v533_v29 = vmul.f32 %v529_v26, %v529_v26  ;;  %v531_v30 = vmul.f32 0.05, %v527_v27  ;;  %v539_v40 = vsub.f32 %v508_v7, %v529_v26  ;;  %v905_v25 = vld [vmem:[%s1137_s8] ss:$0 sm:$0xff] }
 0x169   : > { %v906_v27 = vld [vmem:[%s1138_s9] ss:$0 sm:$0xff] }
 0x16a   : > { %v540_v31 = vadd.f32 1e-05, %v536_v28  ;;  %v535_v32 = vsub.f32 %v531_v30, %v533_v29 }
 0x16b   : > { %v574_v50 = vpop.permute.xlu1 %573 }
 0x16c   : > { %963 = vrsqrt.f32 %v540_v31  ;;  %v537_v33 = vmax.f32 %v535_v32, 0.0  ;;  %v583_v52 = vmul.f32 %v900_v49, %v574_v50 }
 0x16d   : > { %v570_v51 = vpop.permute.xlu0 %569 }
 0x16e   : > { %v541_v34 = vadd.f32 1e-05, %v537_v33  ;;  %v582_v53 = vmul.f32 %v900_v49, %v570_v51 }
 0x170   : > { %965 = vrsqrt.f32 %v541_v34 }
 0x179   : > { %v964_v36 = vpop.eup %963 }
 0x17a   : > { %v544_v38 = vmul.f32 %v964_v36, %v538_v35 }
 0x17c   : > { %v552_v41 = vmul.f32 %v898_v37, %v544_v38  ;;  %v907_v38 = vld [vmem:[#allocation2] ss:$0 sm:$0xff] }
 0x17d   : > { %v966_v42 = vpop.eup %965 }
 0x17e   : > { %v545_v43 = vmul.f32 %v966_v42, %v539_v40  ;;  %v560_v44 = vadd.f32 %v899_v39, %v552_v41 }
 0x180   : > { %v553_v45 = vmul.f32 %v898_v37, %v545_v43  ;;  %v562_v46 = vmax.f32 %v560_v44, 0.0 }
 0x182   : > { %v561_v47 = vadd.f32 %v899_v39, %v553_v45  ;;  %938 = vmatprep.mubr.msk.f32.mxu1 %vm513_vm1, %v562_v46 }
 0x184   : > { %v563_v48 = vmax.f32 %v561_v47, 0.0 }
 0x186   : > { %939 = vmatmul.mubr.msk.f32.vlgmr.msra.gmra.mxu1 %vm513_vm1, %v563_v48 }
 0x246   : > { %v940_v54 = vpop.f32.mrf.mxu1 }
 0x247   : > { %v666_v56 = vadd.f32 %v940_v54, %v583_v52 }
 0x248   : > { %v660_v57 = vpop.f32.mrf.mxu1 }
 0x249   : > { %v677_v58 = vadd.f32 %v904_v55, %v666_v56  ;;  %v661_v59 = vadd.f32 %v660_v57, %v582_v53 }
 0x24b   : > { %v676_v60 = vadd.f32 %v904_v55, %v661_v59  ;;  %v684_v61 = vsel %vm680_vm3, %v677_v58, 0.0  ;;  %v688_v1 = vmul.f32 %v677_v58, %v677_v58 }
 0x24c   : > { %685 = vadd.xlane.f32.xlu0 %v684_v61 }
 0x24d   : > { %v681_v62 = vsel %vm680_vm3, %v676_v60, 0.0  ;;  %v687_v63 = vmul.f32 %v676_v60, %v676_v60  ;;  %v692_v2 = vsel %vm680_vm3, %v688_v1, 0.0 }
 0x24e   : > { %682 = vadd.xlane.f32.xlu1 %v681_v62 }
 0x24f   : > { %v689_v0 = vsel %vm680_vm3, %v687_v63, 0.0 }
 0x252   : > { %690 = vadd.xlane.f32.xlu1 %v689_v0 }
 0x256   : > { %693 = vadd.xlane.f32.xlu1 %v692_v2 }
 0x2d5   : > { %v686_v9 = vpop.xlane.xlu0 %685 }
 0x2d6   : > { %v696_v11 = vmul.f32 0.033333335, %v686_v9 }
 0x2d7   : > { %v683_v7 = vpop.xlane.xlu1 %682 }
 0x2d8   : > { %v695_v8 = vmul.f32 0.033333335, %v683_v7  ;;  %v700_v16 = vmul.f32 %v696_v11, %v696_v11  ;;  %v706_v28 = vsub.f32 %v677_v58, %v696_v11 }
 0x2da   : > { %v699_v12 = vmul.f32 %v695_v8, %v695_v8  ;;  %v705_v23 = vsub.f32 %v676_v60, %v695_v8 }
 0x2db   : > { %v691_v10 = vpop.xlane.xlu1 %690 }
 0x2dc   : > { %v697_v13 = vmul.f32 0.033333335, %v691_v10 }
 0x2de   : > { %v701_v14 = vsub.f32 %v697_v13, %v699_v12 }
 0x2df   : > { %v694_v15 = vpop.xlane.xlu1 %693 }
 0x2e0   : > { %v703_v17 = vmax.f32 %v701_v14, 0.0  ;;  %v698_v18 = vmul.f32 0.033333335, %v694_v15 }
 0x2e2   : > { %v707_v19 = vadd.f32 1e-05, %v703_v17  ;;  %v702_v20 = vsub.f32 %v698_v18, %v700_v16 }
 0x2e4   : > { %967 = vrsqrt.f32 %v707_v19  ;;  %v704_v21 = vmax.f32 %v702_v20, 0.0 }
 0x2e6   : > { %v708_v22 = vadd.f32 1e-05, %v704_v21 }
 0x2e8   : > { %969 = vrsqrt.f32 %v708_v22 }
 0x2f1   : > { %v968_v24 = vpop.eup %967 }
 0x2f2   : > { %v711_v26 = vmul.f32 %v968_v24, %v705_v23 }
 0x2f4   : > { %v719_v29 = vmul.f32 %v905_v25, %v711_v26 }
 0x2f5   : > { %v970_v30 = vpop.eup %969 }
 0x2f6   : > { %v712_v31 = vmul.f32 %v970_v30, %v706_v28  ;;  %v727_v32 = vadd.f32 %v906_v27, %v719_v29 }
 0x2f8   : > { %v720_v33 = vmul.f32 %v905_v25, %v712_v31  ;;  %v729_v34 = vmax.f32 %v727_v32, 0.0 }
 0x2fa   : > { %v728_v35 = vadd.f32 %v906_v27, %v720_v33  ;;  %949 = vmatprep.mubr.msk.f32.mxu0 %vm680_vm3, %v729_v34 }
 0x2fc   : > { %v730_v36 = vmax.f32 %v728_v35, 0.0 }
 0x2fe   : > { %950 = vmatmul.mubr.msk.f32.vlgmr.msra.gmra.mxu0 %vm680_vm3, %v730_v36 }
 0x3be   : > { %v951_v37 = vpop.f32.mrf.mxu0 }
 0x3bf   : > { %v824_v41 = vadd.f32 %v951_v37, %v907_v38 }
 0x3c0   : > { %v818_v39 = vpop.f32.mrf.mxu0 }
 0x3c1   : > { %v819_v40 = vadd.f32 %v907_v38, %v818_v39  ;;  %829 = vst.msk [vmem:[%s417_s29 + $0x8] sm:$0xff] %vm827_vm5, %v824_v41 }
 0x3c3   : > { %828 = vst.msk [vmem:[%s417_s29] sm:$0xff] %vm827_vm5, %v819_v40 }
 0x3c4 PF: > { %s24_s23 = sadd.s32 1, %s977_s23  }
 0x3c5   : > { %p21_p4 = scmp.ge.s32.totalorder %s24_s23, 6  }
 0x3c7   :  { %23 = sbr.rel (!%p21_p4) target bundleno = 3 (0x3), region = 98 }

</bundles_post_ra>
